<compile_context>
chip_gen: v6e
topology: v6e:2x2x1
jax: 0.10.0
libtpu: 0.0.40
codegen_flags: <defaults>
</compile_context>

<pallas_src>
import functools
from typing import NamedTuple

import jax
import jax.numpy as jnp
from jax.experimental import pallas as pl
from jax.experimental.pallas import tpu as pltpu


def _round_up(x, m):
    return (x + m - 1) // m * m


def _pad_dim(d):
    # Lane alignment (128) is mandatory; for larger dims prefer 256-alignment so
    # the 256-wide MXU on v6e/v7x never runs half-filled passes (harmless on v5e).
    return _round_up(d, 256) if d > 256 else _round_up(d, 128)


class PreparedParams(NamedTuple):
    """Padded / pre-cast parameters. Build ONCE with prepare_params()."""
    w1: jax.Array       # [Ip, Hp] bf16
    b1: jax.Array       # [1, Hp]  f32
    w2: jax.Array       # [Hp, Op] bf16
    w_skip: jax.Array   # [Ip, Op] bf16
    b_fused: jax.Array  # [1, Op]  f32   (= b2 + b_skip)
    gamma: jax.Array    # [1, Op]  f32
    beta: jax.Array     # [1, Op]  f32
    input_dim: int
    hidden: int
    output_dim: int


def prepare_params(params):
    """One-time pad + cast of the parameter pytree (call OUTSIDE the hot loop)."""
    input_dim, hidden = params["w1"].shape
    output_dim = params["w_skip"].shape[1]
    Ip, Hp, Op = _pad_dim(input_dim), _pad_dim(hidden), _pad_dim(output_dim)

    def pad2(a, rows, cols):
        return jnp.pad(a, ((0, rows - a.shape[0]), (0, cols - a.shape[1])))

    return PreparedParams(
        w1=pad2(params["w1"], Ip, Hp).astype(jnp.bfloat16),
        b1=pad2(params["b1"], 1, Hp).astype(jnp.float32),
        w2=pad2(params["w2"], Hp, Op).astype(jnp.bfloat16),
        w_skip=pad2(params["w_skip"], Ip, Op).astype(jnp.bfloat16),
        b_fused=pad2(params["b2"] + params["b_skip"], 1, Op).astype(jnp.float32),
        gamma=pad2(params["ln_gamma"], 1, Op).astype(jnp.float32),
        beta=pad2(params["ln_beta"], 1, Op).astype(jnp.float32),
        input_dim=int(input_dim), hidden=int(hidden), output_dim=int(output_dim),
    )


def _resblock_kernel(x_ref, w1_ref, b1_ref, w2_ref, ws_ref, bf_ref,
                     gamma_ref, beta_ref, o_ref, *, true_out_dim, use_layer_norm):
    # x arrives f32; cast to bf16 on the VPU (hidden under the MXU).
    x = x_ref[...].astype(jnp.bfloat16)                          # [TB, Ip]

    # Linear1 (bf16 inputs, f32 MXU accumulation) + bias + ReLU.
    h = jnp.dot(x, w1_ref[...], preferred_element_type=jnp.float32) + b1_ref[...]
    h = jnp.maximum(h, 0.0)

    # Linear2(h) and Linear_skip(x) share one f32 accumulator; their biases
    # are pre-fused into bf_ref = b2 + b_skip.
    y = (jnp.dot(h.astype(jnp.bfloat16), w2_ref[...],
                 preferred_element_type=jnp.float32)
         + jnp.dot(x, ws_ref[...], preferred_element_type=jnp.float32)
         + bf_ref[...])
    # TODO(synk): nn.Dropout is identity in eval mode; training-mode dropout omitted.

    if use_layer_norm:
        # Padded output lanes are exactly 0 (zero-padded weights/biases), so the
        # plain sum gives the true mean when divided by the TRUE output_dim.
        inv_n = jnp.float32(1.0 / true_out_dim)
        mean = jnp.sum(y, axis=-1, keepdims=True) * inv_n
        diff = y - mean
        if y.shape[-1] != true_out_dim:
            # Mask padded lanes (where diff == -mean) out of the variance.
            lane = jax.lax.broadcasted_iota(jnp.int32, y.shape, 1)
            diff = jnp.where(lane < true_out_dim, diff, 0.0)
        var = jnp.sum(diff * diff, axis=-1, keepdims=True) * inv_n   # two-pass: robust
        y = diff * jax.lax.rsqrt(var + 1e-5) * gamma_ref[...] + beta_ref[...]

    o_ref[...] = y.astype(o_ref.dtype)


def residual_block(x, prep, use_layer_norm=True, block_rows=256, out_dtype=None):
    """x: [B, input_dim] float32.  prep: PreparedParams (see prepare_params)."""
    if isinstance(prep, dict):            # convenience path; costs an extra HBM pass
        prep = prepare_params(prep)

    B, input_dim = x.shape
    assert input_dim == prep.input_dim
    Ip, Hp = prep.w1.shape
    Op = prep.w2.shape[1]
    out_dtype = x.dtype if out_dtype is None else jnp.dtype(out_dtype)
    out_bytes = jnp.dtype(out_dtype).itemsize

    # ---- row tiling -------------------------------------------------------
    B8 = _round_up(B, 8)
    block_rows = max(8, _round_up(block_rows, 8))
    # >=2 grid steps whenever possible so the "parallel" batch axis shards across
    # v7x's two TensorCores; TB keeps batch-padding waste < 8 rows per tile.
    num_tiles = max(pl.cdiv(B8, block_rows), 2 if B8 >= 16 else 1)
    TB = _round_up(pl.cdiv(B8, num_tiles), 8)

    weights_bytes = ((Ip * Hp + Hp * Op + Ip * Op) * 2      # bf16 weights (single-buffered)
                     + (Hp + 3 * Op) * 4)                   # biases / LN params (f32)

    def vmem_need(tb):
        x_tiles = 2 * tb * Ip * 4              # f32 input tile, double-buffered
        o_tiles = 2 * tb * Op * out_bytes      # output tile, double-buffered
        interm = tb * (Ip * 2 + Hp * 6 + Op * 8)   # bf16 x, f32+bf16 h, f32 y + LN temps
        return weights_bytes + x_tiles + o_tiles + interm

    # Keep per-step footprint v7x-safe (64 MiB physical VMEM); v5e/v6e (128 MiB)
    # fit the same budget with headroom.
    VMEM_BUDGET = 44 << 20
    while vmem_need(TB) > VMEM_BUDGET and TB > 8:
        TB = max(8, _round_up(TB // 2, 8))
    # TODO(synk): if weights_bytes alone exceeds the budget (very large TiDE
    # input_dim on v7x), add a reduction grid axis over Ip chunks with a VMEM
    # f32 accumulator instead of shrinking TB further.

    num_tiles = pl.cdiv(B8, TB)
    Bp = TB * num_tiles

    # Only pad x when actually required; keep it f32 (no wrapper-side cast pass).
    xp = x if (Bp == B and Ip == input_dim) else jnp.pad(
        x, ((0, Bp - B), (0, Ip - input_dim)))

    kernel = functools.partial(_resblock_kernel,
                               true_out_dim=prep.output_dim,
                               use_layer_norm=use_layer_norm)

    flops = 2 * Bp * (Ip * Hp + Hp * Op + Ip * Op)
    bytes_accessed = Bp * Ip * 4 + weights_bytes + Bp * Op * out_bytes
    need = vmem_need(TB)
    vmem_limit = int(min(110 << 20, max(32 << 20, 2 * need)))

    def run(single_buffer_weights):
        def row_spec(shape):   # tiled along batch
            return pl.BlockSpec(shape, lambda i: (i, 0))

        def fix_spec(shape):   # grid-invariant: weights / biases / LN params
            if single_buffer_weights:
                return pl.BlockSpec(shape, lambda i: (0, 0),
                                    pipeline_mode=pl.Buffered(1))
            return pl.BlockSpec(shape, lambda i: (0, 0))

        return pl.pallas_call(
            kernel,
            out_shape=jax.ShapeDtypeStruct((Bp, Op), out_dtype),
            grid=(num_tiles,),
            in_specs=[row_spec((TB, Ip)),
                      fix_spec((Ip, Hp)), fix_spec((1, Hp)),
                      fix_spec((Hp, Op)), fix_spec((Ip, Op)),
                      fix_spec((1, Op)), fix_spec((1, Op)), fix_spec((1, Op))],
            out_specs=row_spec((TB, Op)),
            compiler_params=pltpu.CompilerParams(
                dimension_semantics=("parallel",),
                vmem_limit_bytes=vmem_limit),
            cost_estimate=pl.CostEstimate(
                flops=flops,
                transcendentals=Bp if use_layer_norm else 0,
                bytes_accessed=bytes_accessed),
        )(xp, prep.w1, prep.b1, prep.w2, prep.w_skip,
          prep.b_fused, prep.gamma, prep.beta)

    try:
        out = run(single_buffer_weights=True)
    except Exception:
        # Fallback if this runtime rejects pl.Buffered(1) on invariant inputs.
        out = run(single_buffer_weights=False)

    if Bp != B or Op != prep.output_dim:
        out = out[:B, :prep.output_dim]
    return out


def init_params(key, input_dim, output_dim, hidden_size):
    """Deterministic synthetic parameters (shapes match the PyTorch module)."""
    ks = jax.random.split(key, 6)
    scale = 0.1
    return {
        # stored as [in, out] (transposed vs torch nn.Linear.weight)
        "w1": scale * jax.random.normal(ks[0], (input_dim, hidden_size), jnp.float32),
        "b1": scale * jax.random.normal(ks[1], (1, hidden_size), jnp.float32),
        "w2": scale * jax.random.normal(ks[2], (hidden_size, output_dim), jnp.float32),
        "b2": scale * jax.random.normal(ks[3], (1, output_dim), jnp.float32),
        "w_skip": scale * jax.random.normal(ks[4], (input_dim, output_dim), jnp.float32),
        "b_skip": scale * jax.random.normal(ks[5], (1, output_dim), jnp.float32),
        "ln_gamma": jnp.ones((1, output_dim), jnp.float32),
        "ln_beta": jnp.zeros((1, output_dim), jnp.float32),
    }


def _reference(x, params, use_layer_norm):
    """Pure-JAX reference using the same bf16 matmul inputs / f32 accumulation."""
    bf16 = jnp.bfloat16
    xb = x.astype(bf16)
    h = jnp.dot(xb, params["w1"].astype(bf16),
                preferred_element_type=jnp.float32) + params["b1"]
    h = jnp.maximum(h, 0.0)
    y = (jnp.dot(h.astype(bf16), params["w2"].astype(bf16),
                 preferred_element_type=jnp.float32) + params["b2"]
         + jnp.dot(xb, params["w_skip"].astype(bf16),
                   preferred_element_type=jnp.float32) + params["b_skip"])
    if use_layer_norm:
        mean = jnp.mean(y, axis=-1, keepdims=True)
        var = jnp.mean((y - mean) ** 2, axis=-1, keepdims=True)
        y = (y - mean) * jax.lax.rsqrt(var + 1e-5) * params["ln_gamma"] + params["ln_beta"]
    return y


if __name__ == "__main__":
    # Small shapes consistent with the module's forward; batch=10 exercises both
    # row padding and a 2-step "parallel" grid.
    batch, input_dim, hidden_size, output_dim = 10, 16, 32, 16

    key = jax.random.PRNGKey(0)
    k_x, k_p = jax.random.split(key)
    x = jax.random.normal(k_x, (batch, input_dim), jnp.float32)
    params = init_params(k_p, input_dim, output_dim, hidden_size)
    prep = prepare_params(params)          # one-time pad/cast, NOT per call

    for use_ln in (True, False):
        out = jax.block_until_ready(residual_block(x, prep, use_layer_norm=use_ln))
        ref = _reference(x, params, use_ln)
        assert out.shape == (batch, output_dim)
        assert jnp.allclose(out, ref, atol=2e-3, rtol=2e-3), \
            f"mismatch vs reference (use_layer_norm={use_ln})"

    print("KERNEL_OK")
</pallas_src>

<mosaic_0001>
module attributes {stable_mosaic.version = 11 : i64} {
  func.func @_resblock_kernel(%arg0: i32, %arg1: memref<8x128xf32, #tpu.memory_space<vmem>>, %arg2: memref<128x128xbf16, #tpu.memory_space<vmem>>, %arg3: memref<1x128xf32, #tpu.memory_space<vmem>>, %arg4: memref<128x128xbf16, #tpu.memory_space<vmem>>, %arg5: memref<128x128xbf16, #tpu.memory_space<vmem>>, %arg6: memref<1x128xf32, #tpu.memory_space<vmem>>, %arg7: memref<1x128xf32, #tpu.memory_space<vmem>>, %arg8: memref<1x128xf32, #tpu.memory_space<vmem>>, %arg9: memref<8x128xf32, #tpu.memory_space<vmem>>) attributes {dimension_semantics = [#tpu.dimension_semantics<parallel>], iteration_bounds = array<i64: 2>, scalar_prefetch = 0 : i64, scratch_operands = 0 : i64, tpu.core_type = #tpu.core_type<tc>, window_params = [{transform_indices = @transform_0, window_bounds = array<i64: 8, 128>}, {pipeline_mode = #tpu.pipeline_mode<synchronous>, transform_indices = @transform_1, window_bounds = array<i64: 128, 128>}, {pipeline_mode = #tpu.pipeline_mode<synchronous>, transform_indices = @transform_2, window_bounds = array<i64: 1, 128>}, {pipeline_mode = #tpu.pipeline_mode<synchronous>, transform_indices = @transform_3, window_bounds = array<i64: 128, 128>}, {pipeline_mode = #tpu.pipeline_mode<synchronous>, transform_indices = @transform_4, window_bounds = array<i64: 128, 128>}, {pipeline_mode = #tpu.pipeline_mode<synchronous>, transform_indices = @transform_5, window_bounds = array<i64: 1, 128>}, {pipeline_mode = #tpu.pipeline_mode<synchronous>, transform_indices = @transform_6, window_bounds = array<i64: 1, 128>}, {pipeline_mode = #tpu.pipeline_mode<synchronous>, transform_indices = @transform_7, window_bounds = array<i64: 1, 128>}, {transform_indices = @transform_8, window_bounds = array<i64: 8, 128>}]} {
    %c0 = arith.constant 0 : index
    %c0_0 = arith.constant 0 : index
    %0 = vector.load %arg1[%c0, %c0_0] : memref<8x128xf32, #tpu.memory_space<vmem>>, vector<8x128xf32>
    %1 = arith.truncf %0 : vector<8x128xf32> to vector<8x128xbf16>
    %c0_1 = arith.constant 0 : index
    %c0_2 = arith.constant 0 : index
    %2 = vector.load %arg2[%c0_1, %c0_2] : memref<128x128xbf16, #tpu.memory_space<vmem>>, vector<128x128xbf16>
    %cst = arith.constant dense<0.000000e+00> : vector<8x128xf32>
    %3 = tpu.matmul %1, %2, %cst {dimension_numbers = #tpu.dot_dimension_numbers<[1], [0], [0], [1], [0, 0, 1, 1], [], []>} : vector<8x128xbf16>, vector<128x128xbf16>, vector<8x128xf32> -> vector<8x128xf32>
    %c0_3 = arith.constant 0 : index
    %c0_4 = arith.constant 0 : index
    %4 = vector.load %arg3[%c0_3, %c0_4] : memref<1x128xf32, #tpu.memory_space<vmem>>, vector<1x128xf32>
    %5 = vector.broadcast %4 : vector<1x128xf32> to vector<8x128xf32>
    %6 = arith.addf %3, %5 : vector<8x128xf32>
    %cst_5 = arith.constant 0.000000e+00 : f32
    %7 = vector.broadcast %cst_5 : f32 to vector<8x128xf32>
    %8 = arith.maximumf %6, %7 : vector<8x128xf32>
    %9 = arith.truncf %8 : vector<8x128xf32> to vector<8x128xbf16>
    %c0_6 = arith.constant 0 : index
    %c0_7 = arith.constant 0 : index
    %10 = vector.load %arg4[%c0_6, %c0_7] : memref<128x128xbf16, #tpu.memory_space<vmem>>, vector<128x128xbf16>
    %cst_8 = arith.constant dense<0.000000e+00> : vector<8x128xf32>
    %11 = tpu.matmul %9, %10, %cst_8 {dimension_numbers = #tpu.dot_dimension_numbers<[1], [0], [0], [1], [0, 0, 1, 1], [], []>} : vector<8x128xbf16>, vector<128x128xbf16>, vector<8x128xf32> -> vector<8x128xf32>
    %c0_9 = arith.constant 0 : index
    %c0_10 = arith.constant 0 : index
    %12 = vector.load %arg5[%c0_9, %c0_10] : memref<128x128xbf16, #tpu.memory_space<vmem>>, vector<128x128xbf16>
    %cst_11 = arith.constant dense<0.000000e+00> : vector<8x128xf32>
    %13 = tpu.matmul %1, %12, %cst_11 {dimension_numbers = #tpu.dot_dimension_numbers<[1], [0], [0], [1], [0, 0, 1, 1], [], []>} : vector<8x128xbf16>, vector<128x128xbf16>, vector<8x128xf32> -> vector<8x128xf32>
    %14 = arith.addf %11, %13 : vector<8x128xf32>
    %c0_12 = arith.constant 0 : index
    %c0_13 = arith.constant 0 : index
    %15 = vector.load %arg6[%c0_12, %c0_13] : memref<1x128xf32, #tpu.memory_space<vmem>>, vector<1x128xf32>
    %16 = vector.broadcast %15 : vector<1x128xf32> to vector<8x128xf32>
    %17 = arith.addf %14, %16 : vector<8x128xf32>
    %cst_14 = arith.constant dense<0.000000e+00> : vector<8xf32>
    %18 = vector.multi_reduction <add>, %17, %cst_14 [1] : vector<8x128xf32> to vector<8xf32>
    %19 = vector.shape_cast %18 : vector<8xf32> to vector<8x1xf32>
    %cst_15 = arith.constant 6.250000e-02 : f32
    %20 = vector.broadcast %cst_15 : f32 to vector<8x1xf32>
    %21 = arith.mulf %19, %20 : vector<8x1xf32>
    %22 = vector.broadcast %21 : vector<8x1xf32> to vector<8x128xf32>
    %23 = arith.subf %17, %22 : vector<8x128xf32>
    %24 = tpu.iota {dimensions = array<i32: 1>} : vector<8x128xi32>
    %c16_i32 = arith.constant 16 : i32
    %25 = vector.broadcast %c16_i32 : i32 to vector<8x128xi32>
    %26 = arith.cmpi slt, %24, %25 : vector<8x128xi32>
    %cst_16 = arith.constant 0.000000e+00 : f32
    %27 = vector.broadcast %cst_16 : f32 to vector<8x128xf32>
    %28 = arith.select %26, %23, %27 : vector<8x128xi1>, vector<8x128xf32>
    %29 = arith.mulf %28, %28 : vector<8x128xf32>
    %cst_17 = arith.constant dense<0.000000e+00> : vector<8xf32>
    %30 = vector.multi_reduction <add>, %29, %cst_17 [1] : vector<8x128xf32> to vector<8xf32>
    %31 = vector.shape_cast %30 : vector<8xf32> to vector<8x1xf32>
    %cst_18 = arith.constant 6.250000e-02 : f32
    %32 = vector.broadcast %cst_18 : f32 to vector<8x1xf32>
    %33 = arith.mulf %31, %32 : vector<8x1xf32>
    %cst_19 = arith.constant 9.99999974E-6 : f32
    %34 = vector.broadcast %cst_19 : f32 to vector<8x1xf32>
    %35 = arith.addf %33, %34 : vector<8x1xf32>
    %36 = math.rsqrt %35 : vector<8x1xf32>
    %37 = vector.broadcast %36 : vector<8x1xf32> to vector<8x128xf32>
    %38 = arith.mulf %28, %37 : vector<8x128xf32>
    %c0_20 = arith.constant 0 : index
    %c0_21 = arith.constant 0 : index
    %39 = vector.load %arg7[%c0_20, %c0_21] : memref<1x128xf32, #tpu.memory_space<vmem>>, vector<1x128xf32>
    %40 = vector.broadcast %39 : vector<1x128xf32> to vector<8x128xf32>
    %41 = arith.mulf %38, %40 : vector<8x128xf32>
    %c0_22 = arith.constant 0 : index
    %c0_23 = arith.constant 0 : index
    %42 = vector.load %arg8[%c0_22, %c0_23] : memref<1x128xf32, #tpu.memory_space<vmem>>, vector<1x128xf32>
    %43 = vector.broadcast %42 : vector<1x128xf32> to vector<8x128xf32>
    %44 = arith.addf %41, %43 : vector<8x128xf32>
    %c0_24 = arith.constant 0 : index
    %c0_25 = arith.constant 0 : index
    %45 = vector.load %arg9[%c0_24, %c0_25] : memref<8x128xf32, #tpu.memory_space<vmem>>, vector<8x128xf32>
    tpu.vector_store %arg9[%c0_24, %c0_25], %44 {strides = array<i32>} : memref<8x128xf32, #tpu.memory_space<vmem>>, vector<8x128xf32>,
    return
  }
  func.func @transform_0(%arg0: i32) -> (i32, i32) {
    %c0_i32 = arith.constant 0 : i32
    %c0_i32_0 = arith.constant 0 : i32
    return %arg0, %c0_i32 : i32, i32
  }
  func.func @transform_1(%arg0: i32) -> (i32, i32) {
    %c0_i32 = arith.constant 0 : i32
    %c0_i32_0 = arith.constant 0 : i32
    %c0_i32_1 = arith.constant 0 : i32
    return %c0_i32, %c0_i32_0 : i32, i32
  }
  func.func @transform_2(%arg0: i32) -> (i32, i32) {
    %c0_i32 = arith.constant 0 : i32
    %c0_i32_0 = arith.constant 0 : i32
    %c0_i32_1 = arith.constant 0 : i32
    return %c0_i32, %c0_i32_0 : i32, i32
  }
  func.func @transform_3(%arg0: i32) -> (i32, i32) {
    %c0_i32 = arith.constant 0 : i32
    %c0_i32_0 = arith.constant 0 : i32
    %c0_i32_1 = arith.constant 0 : i32
    return %c0_i32, %c0_i32_0 : i32, i32
  }
  func.func @transform_4(%arg0: i32) -> (i32, i32) {
    %c0_i32 = arith.constant 0 : i32
    %c0_i32_0 = arith.constant 0 : i32
    %c0_i32_1 = arith.constant 0 : i32
    return %c0_i32, %c0_i32_0 : i32, i32
  }
  func.func @transform_5(%arg0: i32) -> (i32, i32) {
    %c0_i32 = arith.constant 0 : i32
    %c0_i32_0 = arith.constant 0 : i32
    %c0_i32_1 = arith.constant 0 : i32
    return %c0_i32, %c0_i32_0 : i32, i32
  }
  func.func @transform_6(%arg0: i32) -> (i32, i32) {
    %c0_i32 = arith.constant 0 : i32
    %c0_i32_0 = arith.constant 0 : i32
    %c0_i32_1 = arith.constant 0 : i32
    return %c0_i32, %c0_i32_0 : i32, i32
  }
  func.func @transform_7(%arg0: i32) -> (i32, i32) {
    %c0_i32 = arith.constant 0 : i32
    %c0_i32_0 = arith.constant 0 : i32
    %c0_i32_1 = arith.constant 0 : i32
    return %c0_i32, %c0_i32_0 : i32, i32
  }
  func.func @transform_8(%arg0: i32) -> (i32, i32) {
    %c0_i32 = arith.constant 0 : i32
    %c0_i32_0 = arith.constant 0 : i32
    return %arg0, %c0_i32 : i32, i32
  }
}

module attributes {stable_mosaic.version = 11 : i64} {
  func.func @_resblock_kernel(%arg0: i32, %arg1: memref<8x128xf32, #tpu.memory_space<vmem>>, %arg2: memref<128x128xbf16, #tpu.memory_space<vmem>>, %arg3: memref<1x128xf32, #tpu.memory_space<vmem>>, %arg4: memref<128x128xbf16, #tpu.memory_space<vmem>>, %arg5: memref<128x128xbf16, #tpu.memory_space<vmem>>, %arg6: memref<1x128xf32, #tpu.memory_space<vmem>>, %arg7: memref<1x128xf32, #tpu.memory_space<vmem>>, %arg8: memref<1x128xf32, #tpu.memory_space<vmem>>, %arg9: memref<8x128xf32, #tpu.memory_space<vmem>>) attributes {dimension_semantics = [#tpu.dimension_semantics<parallel>], iteration_bounds = array<i64: 2>, scalar_prefetch = 0 : i64, scratch_operands = 0 : i64, tpu.core_type = #tpu.core_type<tc>, window_params = [{transform_indices = @transform_0, window_bounds = array<i64: 8, 128>}, {pipeline_mode = #tpu.pipeline_mode<synchronous>, transform_indices = @transform_1, window_bounds = array<i64: 128, 128>}, {pipeline_mode = #tpu.pipeline_mode<synchronous>, transform_indices = @transform_2, window_bounds = array<i64: 1, 128>}, {pipeline_mode = #tpu.pipeline_mode<synchronous>, transform_indices = @transform_3, window_bounds = array<i64: 128, 128>}, {pipeline_mode = #tpu.pipeline_mode<synchronous>, transform_indices = @transform_4, window_bounds = array<i64: 128, 128>}, {pipeline_mode = #tpu.pipeline_mode<synchronous>, transform_indices = @transform_5, window_bounds = array<i64: 1, 128>}, {pipeline_mode = #tpu.pipeline_mode<synchronous>, transform_indices = @transform_6, window_bounds = array<i64: 1, 128>}, {pipeline_mode = #tpu.pipeline_mode<synchronous>, transform_indices = @transform_7, window_bounds = array<i64: 1, 128>}, {transform_indices = @transform_8, window_bounds = array<i64: 8, 128>}]} {
    %c0 = arith.constant 0 : index
    %c0_0 = arith.constant 0 : index
    %0 = vector.load %arg1[%c0, %c0_0] : memref<8x128xf32, #tpu.memory_space<vmem>>, vector<8x128xf32>
    %1 = arith.truncf %0 : vector<8x128xf32> to vector<8x128xbf16>
    %c0_1 = arith.constant 0 : index
    %c0_2 = arith.constant 0 : index
    %2 = vector.load %arg2[%c0_1, %c0_2] : memref<128x128xbf16, #tpu.memory_space<vmem>>, vector<128x128xbf16>
    %cst = arith.constant dense<0.000000e+00> : vector<8x128xf32>
    %3 = tpu.matmul %1, %2, %cst {dimension_numbers = #tpu.dot_dimension_numbers<[1], [0], [0], [1], [0, 0, 1, 1], [], []>} : vector<8x128xbf16>, vector<128x128xbf16>, vector<8x128xf32> -> vector<8x128xf32>
    %c0_3 = arith.constant 0 : index
    %c0_4 = arith.constant 0 : index
    %4 = vector.load %arg3[%c0_3, %c0_4] : memref<1x128xf32, #tpu.memory_space<vmem>>, vector<1x128xf32>
    %5 = vector.broadcast %4 : vector<1x128xf32> to vector<8x128xf32>
    %6 = arith.addf %3, %5 : vector<8x128xf32>
    %cst_5 = arith.constant 0.000000e+00 : f32
    %7 = vector.broadcast %cst_5 : f32 to vector<8x128xf32>
    %8 = arith.maximumf %6, %7 : vector<8x128xf32>
    %9 = arith.truncf %8 : vector<8x128xf32> to vector<8x128xbf16>
    %c0_6 = arith.constant 0 : index
    %c0_7 = arith.constant 0 : index
    %10 = vector.load %arg4[%c0_6, %c0_7] : memref<128x128xbf16, #tpu.memory_space<vmem>>, vector<128x128xbf16>
    %cst_8 = arith.constant dense<0.000000e+00> : vector<8x128xf32>
    %11 = tpu.matmul %9, %10, %cst_8 {dimension_numbers = #tpu.dot_dimension_numbers<[1], [0], [0], [1], [0, 0, 1, 1], [], []>} : vector<8x128xbf16>, vector<128x128xbf16>, vector<8x128xf32> -> vector<8x128xf32>
    %c0_9 = arith.constant 0 : index
    %c0_10 = arith.constant 0 : index
    %12 = vector.load %arg5[%c0_9, %c0_10] : memref<128x128xbf16, #tpu.memory_space<vmem>>, vector<128x128xbf16>
    %cst_11 = arith.constant dense<0.000000e+00> : vector<8x128xf32>
    %13 = tpu.matmul %1, %12, %cst_11 {dimension_numbers = #tpu.dot_dimension_numbers<[1], [0], [0], [1], [0, 0, 1, 1], [], []>} : vector<8x128xbf16>, vector<128x128xbf16>, vector<8x128xf32> -> vector<8x128xf32>
    %14 = arith.addf %11, %13 : vector<8x128xf32>
    %c0_12 = arith.constant 0 : index
    %c0_13 = arith.constant 0 : index
    %15 = vector.load %arg6[%c0_12, %c0_13] : memref<1x128xf32, #tpu.memory_space<vmem>>, vector<1x128xf32>
    %16 = vector.broadcast %15 : vector<1x128xf32> to vector<8x128xf32>
    %17 = arith.addf %14, %16 : vector<8x128xf32>
    %cst_14 = arith.constant dense<0.000000e+00> : vector<8xf32>
    %18 = vector.multi_reduction <add>, %17, %cst_14 [1] : vector<8x128xf32> to vector<8xf32>
    %19 = vector.shape_cast %18 : vector<8xf32> to vector<8x1xf32>
    %cst_15 = arith.constant 6.250000e-02 : f32
    %20 = vector.broadcast %cst_15 : f32 to vector<8x1xf32>
    %21 = arith.mulf %19, %20 : vector<8x1xf32>
    %22 = vector.broadcast %21 : vector<8x1xf32> to vector<8x128xf32>
    %23 = arith.subf %17, %22 : vector<8x128xf32>
    %24 = tpu.iota {dimensions = array<i32: 1>} : vector<8x128xi32>
    %c16_i32 = arith.constant 16 : i32
    %25 = vector.broadcast %c16_i32 : i32 to vector<8x128xi32>
    %26 = arith.cmpi slt, %24, %25 : vector<8x128xi32>
    %cst_16 = arith.constant 0.000000e+00 : f32
    %27 = vector.broadcast %cst_16 : f32 to vector<8x128xf32>
    %28 = arith.select %26, %23, %27 : vector<8x128xi1>, vector<8x128xf32>
    %29 = arith.mulf %28, %28 : vector<8x128xf32>
    %cst_17 = arith.constant dense<0.000000e+00> : vector<8xf32>
    %30 = vector.multi_reduction <add>, %29, %cst_17 [1] : vector<8x128xf32> to vector<8xf32>
    %31 = vector.shape_cast %30 : vector<8xf32> to vector<8x1xf32>
    %cst_18 = arith.constant 6.250000e-02 : f32
    %32 = vector.broadcast %cst_18 : f32 to vector<8x1xf32>
    %33 = arith.mulf %31, %32 : vector<8x1xf32>
    %cst_19 = arith.constant 9.99999974E-6 : f32
    %34 = vector.broadcast %cst_19 : f32 to vector<8x1xf32>
    %35 = arith.addf %33, %34 : vector<8x1xf32>
    %36 = math.rsqrt %35 : vector<8x1xf32>
    %37 = vector.broadcast %36 : vector<8x1xf32> to vector<8x128xf32>
    %38 = arith.mulf %28, %37 : vector<8x128xf32>
    %c0_20 = arith.constant 0 : index
    %c0_21 = arith.constant 0 : index
    %39 = vector.load %arg7[%c0_20, %c0_21] : memref<1x128xf32, #tpu.memory_space<vmem>>, vector<1x128xf32>
    %40 = vector.broadcast %39 : vector<1x128xf32> to vector<8x128xf32>
    %41 = arith.mulf %38, %40 : vector<8x128xf32>
    %c0_22 = arith.constant 0 : index
    %c0_23 = arith.constant 0 : index
    %42 = vector.load %arg8[%c0_22, %c0_23] : memref<1x128xf32, #tpu.memory_space<vmem>>, vector<1x128xf32>
    %43 = vector.broadcast %42 : vector<1x128xf32> to vector<8x128xf32>
    %44 = arith.addf %41, %43 : vector<8x128xf32>
    %c0_24 = arith.constant 0 : index
    %c0_25 = arith.constant 0 : index
    %45 = vector.load %arg9[%c0_24, %c0_25] : memref<8x128xf32, #tpu.memory_space<vmem>>, vector<8x128xf32>
    tpu.vector_store %arg9[%c0_24, %c0_25], %44 {strides = array<i32>} : memref<8x128xf32, #tpu.memory_space<vmem>>, vector<8x128xf32>,
    return
  }
  func.func @transform_0(%arg0: i32) -> (i32, i32) {
    %c0_i32 = arith.constant 0 : i32
    %c0_i32_0 = arith.constant 0 : i32
    return %arg0, %c0_i32 : i32, i32
  }
  func.func @transform_1(%arg0: i32) -> (i32, i32) {
    %c0_i32 = arith.constant 0 : i32
    %c0_i32_0 = arith.constant 0 : i32
    %c0_i32_1 = arith.constant 0 : i32
    return %c0_i32, %c0_i32_0 : i32, i32
  }
  func.func @transform_2(%arg0: i32) -> (i32, i32) {
    %c0_i32 = arith.constant 0 : i32
    %c0_i32_0 = arith.constant 0 : i32
    %c0_i32_1 = arith.constant 0 : i32
    return %c0_i32, %c0_i32_0 : i32, i32
  }
  func.func @transform_3(%arg0: i32) -> (i32, i32) {
    %c0_i32 = arith.constant 0 : i32
    %c0_i32_0 = arith.constant 0 : i32
    %c0_i32_1 = arith.constant 0 : i32
    return %c0_i32, %c0_i32_0 : i32, i32
  }
  func.func @transform_4(%arg0: i32) -> (i32, i32) {
    %c0_i32 = arith.constant 0 : i32
    %c0_i32_0 = arith.constant 0 : i32
    %c0_i32_1 = arith.constant 0 : i32
    return %c0_i32, %c0_i32_0 : i32, i32
  }
  func.func @transform_5(%arg0: i32) -> (i32, i32) {
    %c0_i32 = arith.constant 0 : i32
    %c0_i32_0 = arith.constant 0 : i32
    %c0_i32_1 = arith.constant 0 : i32
    return %c0_i32, %c0_i32_0 : i32, i32
  }
  func.func @transform_6(%arg0: i32) -> (i32, i32) {
    %c0_i32 = arith.constant 0 : i32
    %c0_i32_0 = arith.constant 0 : i32
    %c0_i32_1 = arith.constant 0 : i32
    return %c0_i32, %c0_i32_0 : i32, i32
  }
  func.func @transform_7(%arg0: i32) -> (i32, i32) {
    %c0_i32 = arith.constant 0 : i32
    %c0_i32_0 = arith.constant 0 : i32
    %c0_i32_1 = arith.constant 0 : i32
    return %c0_i32, %c0_i32_0 : i32, i32
  }
  func.func @transform_8(%arg0: i32) -> (i32, i32) {
    %c0_i32 = arith.constant 0 : i32
    %c0_i32_0 = arith.constant 0 : i32
    return %arg0, %c0_i32 : i32, i32
  }
}

</mosaic_0001>

<bundles_post_ra>
// kernel: tpu_custom_call.1
= control target key start
LH: loop header
LB: loop body
LE: loop exit
PB: predicated region body
PF: predicated region fallthrough
CT: control target
= control target key end

     0   :  { %s1542_s0 = inlined_call_operand.hbm [shape: f32[16,128], index: 0, kind: input, shape index: {}]   ;;  %s1543_s1 = inlined_call_operand.hbm [shape: bf16[128,128], index: 1, kind: input, shape index: {}]   ;;  %s1544_s2 = inlined_call_operand.vmem [shape: f32[1,128], index: 2, kind: input, shape index: {}]   ;;  %s1545_s3 = inlined_call_operand.hbm [shape: bf16[128,128], index: 3, kind: input, shape index: {}]   ;;  %s1546_s4 = inlined_call_operand.hbm [shape: bf16[128,128], index: 4, kind: input, shape index: {}]   ;;  %s1547_s5 = inlined_call_operand.vmem [shape: f32[1,128], index: 5, kind: input, shape index: {}]   ;;  %s1548_s6 = inlined_call_operand.vmem [shape: f32[1,128], index: 6, kind: input, shape index: {}]   ;;  %s1549_s7 = inlined_call_operand.vmem [shape: f32[1,128], index: 7, kind: input, shape index: {}]   ;;  %s1550_s8 = inlined_call_operand.hbm [shape: f32[16,128], index: 8, kind: output, shape index: {}]  }
   0x1   :  { %1555 = sst [smem:[#allocation15_spill]] %s1543_s1 }
   0x2   :  { %1556 = sst [smem:[#allocation16_spill]] %s1545_s3 }
   0x3   :  { %1557 = sst [smem:[#allocation17_spill]] %s1546_s4 }
   0x4   :  { %13 = vsyncpa [#allocation3], 0 }
   0x5   :  { %15 = vsyncpa [#allocation3 + $0x1], 0 }
   0x6   :  { %16 = vsyncpa [#allocation6], 0 }
   0x7   :  { %17 = vsyncpa [#allocation9], 0 }
   0x8   :  { %18 = vsyncpa [#allocation4], 0 }
   0x9   :  { %20 = vsyncpa [#allocation4 + $0x1], 0  ;;  %s1316_s27 = smov 0   ;;  %s1318_s28 = smov 0  }
   0xa   :  { %s1320_s29 = smov 0   ;;  %s1322_s30 = smov 0  }
   0xb LB: > { %s1337_s9 = sadd.s32 4294967295, %s1260_s30   ;;  %s842_s10 = sadd.s32 4294967294, %s1260_s30   ;;  %s1260_s30 = sphi %s1322_s30, %s1580_s30   ;;  %s1256_s29 = sphi %s1320_s29, %s1579_s29   ;;  %s1252_s28 = sphi %s1318_s28, %s1578_s28   ;;  %s1248_s27 = sphi %s1316_s27, %s1577_s27  }
   0xc   : > { %p46_p0 = scmp.ne.s32.totalorder %s1252_s28, %s1248_s27  ;;  %p1551_p1 = scmp.eq.s32.totalorder %s1337_s9, 0 }
   0xd   : > { %p223_p3 = scmp.eq.s32.totalorder %s842_s10, 1  ;;  %p843_p5 = scmp.ge.s32.totalorder %s1260_s30, 1 }
   0xe   : > { %p1346_p4 = por %p1551_p1, %p46_p0  ;;  %p230_p7 = scmp.lt.s32.totalorder %s1260_s30, 3 }
   0xf   : > { %p1351_p6 = por %p223_p3, %p46_p0  ;;  %s1262_s14 = smov [#allocation5]  }
  0x10   : > { %s1558_s11 = scalar_select %p1346_p4, 1, 0 }
  0x11   : > { %s1559_s12 = scalar_select %p1351_p6, 1, 0 }
  0x12   : > { %p1356_p8 = pnand %p843_p5, %p230_p7  ;;  %s242_s15 = sshll.u32 %s1262_s14, 4  ;;  %s243_s15 = int_to_ptr.vmem [resolvable:$true] %s242_s15 }
  0x13   : > { %s1263_s17 = smov [#allocation7]   ;;  %s1264_s19 = smov [#allocation8]  }
  0x14   : > { %s1560_s13 = scalar_select %p1356_p8, 1, 0 }
  0x15   : > { %p991_p9 = pneg %p1356_p8  ;;  %s258_s18 = sshll.u32 %s1263_s17, 4  ;;  %s259_s18 = int_to_ptr.vmem [resolvable:$true] %s258_s18 }
  0x16   : > { %s271_s20 = sshll.u32 %s1264_s19, 4  ;;  %s1093_s21 = scalar_lea.vmem %s243_s15, 1024  ;;  %s272_s20 = int_to_ptr.vmem [resolvable:$true] %s271_s20 }
  0x17   : > { %p1365_p11 = pnand %p991_p9, %p1551_p1  ;;  %p1094_p13 = scmp.ne.s32.totalorder %s243_s15, %s1093_s21 }
  0x18   : > { %p1101_p5 = scmp.lt.s32.totalorder %s243_s15, %s243_s15  ;;  %p1102_p7 = scmp.lt.s32.totalorder %s1093_s21, %s1093_s21 }
  0x19   : > { %p1084_p12 = pneg %p1365_p11 }
  0x1a   : > { %p1103_p9 = por %p1102_p7, %p1101_p5 }
  0x1b   : > { %p1096_p0 = pnand %p1094_p13, %p1084_p12 }
  0x1d   : > { %p1097_p3 = pneg %p1096_p0 }
  0x1f   : > { %p1104_p10 = pnand %p1103_p9, %p1097_p3 }
  0x21   : > { %1107 = shalt.err (!%p1104_p10)
}
  0x22   : > { %s1265_s22 = smov 64   ;;  %s1266_s23 = smov 4  }
  0x23   : > { %s1562_s1 = sld [smem:[#allocation15_spill]]  ;;  %s1119_s26 = scalar_lea.vmem %s259_s18, 1024 }
  0x24   : > { %p1120_p1 = scmp.ne.s32.totalorder %s259_s18, %s1119_s26  ;;  %p1127_p2 = scmp.lt.s32.totalorder %s259_s18, %s259_s18 }
  0x25   : > { %p1128_p6 = scmp.lt.s32.totalorder %s1119_s26, %s1119_s26 }
  0x26   : > { %p1122_p13 = pnand %p1120_p1, %p1084_p12 }
  0x27   : > { %p1129_p5 = por %p1128_p6, %p1127_p2 }
  0x28   : > { %p1123_p0 = pneg %p1122_p13 }
  0x29   : > { %994 = dma.hbm_to_vmem [thread:$0]  (!%p1365_p11), %s1562_s1, 1024, %s243_s15, [#allocation6], %s1265_s22, %s1265_s22, %s1266_s23  }
  0x2a   : > { %p1130_p3 = pnand %p1129_p5, %p1123_p0 }
  0x2c   : > { %1133 = shalt.err (!%p1130_p3)
}
  0x2d   : > { %s1563_s3 = sld [smem:[#allocation16_spill]]  ;;  %s1145_s15 = scalar_lea.vmem %s272_s20, 1024 }
  0x2e   : > { %p1146_p10 = scmp.ne.s32.totalorder %s272_s20, %s1145_s15  ;;  %p1153_p9 = scmp.lt.s32.totalorder %s272_s20, %s272_s20 }
  0x2f   : > { %p1154_p13 = scmp.lt.s32.totalorder %s1145_s15, %s1145_s15 }
  0x30   : > { %p1148_p7 = pnand %p1146_p10, %p1084_p12 }
  0x31   : > { %p1155_p4 = por %p1154_p13, %p1153_p9 }
  0x32   : > { %p1149_p1 = pneg %p1148_p7 }
  0x33   : > { %997 = dma.hbm_to_vmem [thread:$0]  (!%p1365_p11), %s1563_s3, 1024, %s259_s18, [#allocation6], %s1265_s22, %s1265_s22, %s1266_s23  }
  0x34   : > { %p1156_p2 = pnand %p1155_p4, %p1149_p1 }
  0x36   : > { %1159 = shalt.err (!%p1156_p2)
}
  0x37   : > { %s1564_s4 = sld [smem:[#allocation17_spill]]  ;;  %s1396_s18 = sadd.s32 1, %s1260_s30  }
  0x38   : > { %s30_s21 = ssub.s32 %s1260_s30, %s1396_s18  ;;  %s33_s16 = sadd.s32 1, %s1256_s29 }
  0x39   : > { %p31_p4 = scmp.eq.s32.totalorder %s30_s21, 0  ;;  %p40_p6 = scmp.ne.s32.totalorder %s1256_s29, %s1252_s28 }
  0x3a   : > { %p41_p12 = scmp.eq.s32.totalorder %s1260_s30, 0  ;;  %p1012_p0 = scmp.lt.s32.totalorder %s1260_s30, 2 }
  0x3b   : > { %s1406_s24 = scalar_select %p31_p4, %s1256_s29, %s33_s16  }
  0x3c   : > { %p42_p5 = por %p41_p12, %p40_p6  ;;  %p1565_p3 = scmp.eq.s32.totalorder %s1337_s9, 1 }
  0x3d   : > { %1000 = dma.hbm_to_vmem [thread:$0]  (!%p1365_p11), %s1564_s4, 1024, %s272_s20, [#allocation9], %s1265_s22, %s1265_s22, %s1266_s23  }
  0x3e   : > { %p1410_p10 = por %p1565_p3, %p40_p6  ;;  %s294_s26 = sand.u32 1, %s1256_s29  }
  0x3f   : > { %s849_s10 = sshll.u32 %s1260_s30, 7  ;;  %s848_s20 = sshll.u32 %s294_s26, 3 }
  0x40   : > { %s1566_s25 = scalar_select %p1410_p10, 1, 0 }
  0x41   : > { %s1419_s14 = scalar_lea.hbm %s1542_s0, %s849_s10  ;;  %s298_s15 = scalar_lea.vmem [#allocation2], %s848_s20 }
  0x42   : > { %s305_s17 = sshll.u32 %s298_s15, 4  ;;  %p1421_p11 = pnand %p1012_p0, %p42_p5  ;;  %s306_s17 = int_to_ptr.vmem [resolvable:$true] %s305_s17 }
  0x43   : > { %s295_s21 = scalar_lea.sflag [#allocation3], %s294_s26  ;;  %s1160_s16 = scalar_lea.hbm %s1419_s14, 128 }
  0x44   : > { %p1161_p7 = scmp.ne.s32.totalorder %s1419_s14, %s1160_s16  ;;  %p1162_p1 = pneg %p1421_p11 }
  0x45   : > { %s1165_s23 = scalar_lea.hbm %s1542_s0, 256  ;;  %p1166_p2 = scmp.lt.s32.totalorder %s1419_s14, %s1542_s0 }
  0x46   : > { %p1163_p9 = pnand %p1162_p1, %p1161_p7  ;;  %p1167_p4 = scmp.lt.s32.totalorder %s1165_s23, %s1160_s16 }
  0x48   : > { %p1164_p13 = pneg %p1163_p9  ;;  %p1168_p6 = por %p1167_p4, %p1166_p2 }
  0x4a   : > { %p1169_p12 = pnand %p1168_p6, %p1164_p13 }
  0x4c   : > { %1172 = shalt.err (!%p1169_p12)
}
  0x4d   : > { %s1173_s15 = scalar_lea.vmem %s306_s17, 128  ;;  %s1267_s26 = smov [#allocation2]  }
  0x4e   : > { %p1174_p0 = scmp.ne.s32.totalorder %s306_s17, %s1173_s15  ;;  %s1178_s3 = sshll.u32 %s1267_s26, 4  ;;  %s1179_s3 = int_to_ptr.vmem [resolvable:$false] %s1178_s3 }
  0x4f   : > { %s1180_s4 = scalar_lea.vmem %s1179_s3, 256  ;;  %p1181_p7 = scmp.lt.s32.totalorder %s306_s17, %s1179_s3 }
  0x50   : > { %p1176_p5 = pnand %p1174_p0, %p1162_p1  ;;  %p1182_p9 = scmp.lt.s32.totalorder %s1180_s4, %s1173_s15 }
  0x52   : > { %p1177_p3 = pneg %p1176_p5  ;;  %p1183_p10 = por %p1182_p9, %p1181_p7 }
  0x54   : > { %p1184_p8 = pnand %p1183_p10, %p1177_p3 }
  0x56   : > { %1187 = shalt.err (!%p1184_p8)
}
  0x57   : > { %1004 = dma.hbm_to_vmem [thread:$0]  (!%p1421_p11), %s1419_s14, 128, %s306_s17, %s295_s21  }
  0x58   : > { %p1568_p13 = scmp.ne.s32.totalorder %s1560_s13, 0 }
  0x59   : > { %s1442_s1 = sand.u32 (!%p1568_p13), 1, %s1252_s28   ;;  %p1569_p8 = scmp.ne.s32.totalorder (!%p1568_p13), %s1558_s11, 0 }
  0x5a   : > { %314 = sbr.rel (%p1568_p13) target bundleno = 852 (0x354), region = 52  ;;  %s851_s16 = sshll.u32 (!%p1568_p13), %s1442_s1, 3 }
  0x5b   : > { %s317_s3 = scalar_lea.sflag (!%p1568_p13), [#allocation3], %s1442_s1  ;;  %s1448_s4 = scalar_lea.vmem (!%p1568_p13), [#allocation2], %s851_s16 }
  0x5f   : > { %1231 = dma.done.wait (%p1569_p8), %s317_s3, 128  }
  0x60   : > { %1233 = vsyncadd (%p1569_p8), %s317_s3, 4294967168  ;;  %p1570_p10 = scmp.eq.s32.totalorder %s1337_s9, 0 }
  0x62   : > { %1235 = dma.done.wait (%p1570_p10), [#allocation6], 2048   ;;  %p1571_p11 = pmov %p1570_p10 }
  0x63   : > { %p1572_p1 = pmov %p1570_p10 }
  0x64   : > { %1237 = vsyncadd (%p1571_p11), [#allocation6], 4294965248 }
  0x65   : > { %1239 = dma.done.wait (%p1572_p1), [#allocation9], 1024   ;;  %p1573_p2 = pmov %p1572_p1 }
  0x66   : > { %v1268_v0 = vmov 0.0   ;;  %vm1269_vm0 = vmmov 0   ;;  %v1056_v1 = vld [vmem:[#allocation5 + $0x38] sm:$0xff]   ;;  %v1057_v2 = vld [vmem:[#allocation5 + $0x30] sm:$0xff]   ;;  %v1058_v3 = vld [vmem:[#allocation5 + $0x28] sm:$0xff]   ;;  %v701_v46 = vlaneseq  ;;  %s885_s23 = sshll.u32 %s1337_s9, 7 }
  0x67   : > { %1241 = vsyncadd (%p1573_p2), [#allocation9], 4294966272  ;;  %915 = vmatprep.subr.bf16.mxu0 %v1268_v0  ;;  %931 = vmatprep.mubr.msk.bf16.mxu0 %vm1269_vm0, %v1268_v0  ;;  %v1064_v4 = vld [vmem:[#allocation8 + $0x38] sm:$0xff]   ;;  %v1059_v5 = vld [vmem:[#allocation5 + $0x20] sm:$0xff]   ;;  %s364_s20 = scalar_lea.vmem [#allocation10], %s851_s16  ;;  %s730_s11 = scalar_lea.sflag [#allocation4], %s1442_s1 }
  0x68   : > { %935 = vmatprep.subr.bf16.mxu1 %v1268_v0  ;;  %951 = vmatprep.mubr.msk.bf16.mxu1 %vm1269_vm0, %v1268_v0  ;;  %v1065_v6 = vld [vmem:[#allocation8 + $0x30] sm:$0xff]   ;;  %v1060_v7 = vld [vmem:[#allocation5 + $0x18] sm:$0xff]   ;;  %v1067_v8 = vld [vmem:[#allocation8 + $0x28] sm:$0xff]   ;;  %v702_v47 = vand.u32 127, %v701_v46  ;;  %s743_s15 = sshll.u32 %s364_s20, 4  ;;  %p1574_p6 = scmp.ne.s32.totalorder %s1566_s25, 0  ;;  %s744_s15 = int_to_ptr.vmem [resolvable:$true] %s743_s15 }
  0x69   : > { %916 = vmatpush3.bf16.msra.mxu0 %v1056_v1  ;;  %936 = vmatpush3.bf16.msra.mxu1 %v1064_v4  ;;  %v1061_v9 = vld [vmem:[#allocation5 + $0x10] sm:$0xff]   ;;  %v1069_v10 = vld [vmem:[#allocation8 + $0x20] sm:$0xff]   ;;  %v1062_v11 = vld [vmem:[#allocation5 + $0x8] sm:$0xff]   ;;  %s1188_s13 = scalar_lea.vmem %s744_s15, 128  ;;  %s1270_s14 = smov [#allocation10]  }
  0x6a   : > { %917 = vmatprep.subr.bf16.mxu0 %v1268_v0  ;;  %937 = vmatprep.subr.bf16.mxu1 %v1268_v0  ;;  %v1071_v12 = vld [vmem:[#allocation8 + $0x18] sm:$0xff]   ;;  %v1063_v13 = vld [vmem:[#allocation5] sm:$0xff]   ;;  %v1073_v15 = vld [vmem:[#allocation8 + $0x10] sm:$0xff]   ;;  %vm703_vm1 = vcmp.lt.s32.totalorder %v702_v47, 16  ;;  %p1189_p4 = scmp.ne.s32.totalorder %s744_s15, %s1188_s13  ;;  %s1192_s17 = sshll.u32 %s1270_s14, 4  ;;  %s1193_s17 = int_to_ptr.vmem [resolvable:$false] %s1192_s17 }
  0x6b   : > { %v366_v14 = vld [vmem:[%s1448_s4] sm:$0xff]  ;;  %v1075_v18 = vld [vmem:[#allocation8 + $0x8] sm:$0xff]   ;;  %v1077_v20 = vld [vmem:[#allocation8] sm:$0xff]   ;;  %s741_s4 = scalar_lea.hbm %s1550_s8, %s885_s23  ;;  %s1194_s9 = scalar_lea.vmem %s1193_s17, 256 }
  0x6c   : > { %v367_v16 = vpack.c.bf16 %v366_v14, %v366_v14  ;;  %v1066_v17 = vld [vmem:[#allocation7 + $0x38] sm:$0xff]   ;;  %v1068_v19 = vld [vmem:[#allocation7 + $0x30] sm:$0xff]   ;;  %v1070_v21 = vld [vmem:[#allocation7 + $0x28] sm:$0xff]   ;;  %p1190_p12 = pnand %p1189_p4, %p1574_p6  ;;  %p1195_p5 = scmp.lt.s32.totalorder %s744_s15, %s1193_s17 }
  0x6d   : > { %918 = vmatpush3.bf16.msra.mxu0 %v1057_v2  ;;  %938 = vmatpush3.bf16.msra.mxu1 %v1065_v6  ;;  %v1072_v22 = vld [vmem:[#allocation7 + $0x20] sm:$0xff]   ;;  %v1074_v23 = vld [vmem:[#allocation7 + $0x18] sm:$0xff]   ;;  %v1076_v24 = vld [vmem:[#allocation7 + $0x10] sm:$0xff]   ;;  %p1196_p3 = scmp.lt.s32.totalorder %s1194_s9, %s1188_s13 }
  0x6e   : > { %919 = vmatprep.subr.bf16.mxu0 %v1268_v0  ;;  %939 = vmatprep.subr.bf16.mxu1 %v1268_v0  ;;  %v1078_v25 = vld [vmem:[#allocation7 + $0x8] sm:$0xff]   ;;  %v1079_v26 = vld [vmem:[#allocation7] sm:$0xff]   ;;  %v856_v27 = vld [vmem:[%s1544_s2] ss:$0 sm:$0xff]  ;;  %p1191_p0 = pneg %p1190_p12 }
  0x6f   : > { %v881_v40 = vld [vmem:[%s1547_s5] ss:$0 sm:$0xff]  ;;  %p1197_p7 = por %p1196_p3, %p1195_p5 }
  0x70   : > { %v882_v57 = vld [vmem:[%s1548_s6] ss:$0 sm:$0xff] }
  0x71   : > { %920 = vmatpush3.bf16.msra.mxu0 %v1058_v3  ;;  %940 = vmatpush3.bf16.msra.mxu1 %v1067_v8  ;;  %v883_v59 = vld [vmem:[%s1549_s7] ss:$0 sm:$0xff]  ;;  %p1198_p9 = pnand %p1197_p7, %p1191_p0 }
  0x72   : > { %921 = vmatprep.subr.bf16.mxu0 %v1268_v0  ;;  %941 = vmatprep.subr.bf16.mxu1 %v1268_v0 }
  0x75   : > { %922 = vmatpush3.bf16.msra.mxu0 %v1059_v5  ;;  %942 = vmatpush3.bf16.msra.mxu1 %v1069_v10 }
  0x76   : > { %923 = vmatprep.subr.bf16.mxu0 %v1268_v0  ;;  %943 = vmatprep.subr.bf16.mxu1 %v1268_v0 }
  0x79   : > { %924 = vmatpush3.bf16.msra.mxu0 %v1060_v7  ;;  %944 = vmatpush3.bf16.msra.mxu1 %v1071_v12 }
  0x7a   : > { %925 = vmatprep.subr.bf16.mxu0 %v1268_v0  ;;  %945 = vmatprep.subr.bf16.mxu1 %v1268_v0 }
  0x7d   : > { %926 = vmatpush3.bf16.msra.mxu0 %v1061_v9  ;;  %946 = vmatpush3.bf16.msra.mxu1 %v1073_v15 }
  0x7e   : > { %927 = vmatprep.subr.bf16.mxu0 %v1268_v0  ;;  %947 = vmatprep.subr.bf16.mxu1 %v1268_v0 }
  0x81   : > { %928 = vmatpush3.bf16.msra.mxu0 %v1062_v11  ;;  %948 = vmatpush3.bf16.msra.mxu1 %v1075_v18 }
  0x82   : > { %929 = vmatprep.subr.bf16.mxu0 %v1268_v0  ;;  %949 = vmatprep.subr.bf16.mxu1 %v1268_v0 }
  0x85   : > { %930 = vmatpush3.bf16.msra.mxu0 %v1063_v13  ;;  %950 = vmatpush3.bf16.msra.mxu1 %v1077_v20 }
  0x86   : > { %955 = vmatprep.subr.bf16.mxu0 %v1268_v0 }
  0x88   : > { %932 = vmatmul.mubr.bf16.vlgmr.msra.gmra.mxu0 %v367_v16  ;;  %952 = vmatmul.mubr.bf16.vlgmr.msra.gmra.mxu1 %v367_v16 }
  0x89   : > { %956 = vmatpush3.bf16.msra.mxu0 %v1066_v17  ;;  %971 = vmatprep.mubr.msk.bf16.mxu0 %vm1269_vm0, %v1268_v0 }
  0x8a   : > { %957 = vmatprep.subr.bf16.mxu0 %v1268_v0 }
  0x8d   : > { %958 = vmatpush3.bf16.msra.mxu0 %v1068_v19 }
  0x8e   : > { %959 = vmatprep.subr.bf16.mxu0 %v1268_v0 }
  0x91   : > { %960 = vmatpush3.bf16.msra.mxu0 %v1070_v21 }
  0x92   : > { %961 = vmatprep.subr.bf16.mxu0 %v1268_v0 }
  0x95   : > { %962 = vmatpush3.bf16.msra.mxu0 %v1072_v22 }
  0x96   : > { %963 = vmatprep.subr.bf16.mxu0 %v1268_v0 }
  0x99   : > { %964 = vmatpush3.bf16.msra.mxu0 %v1074_v23 }
  0x9a   : > { %965 = vmatprep.subr.bf16.mxu0 %v1268_v0 }
  0x9d   : > { %966 = vmatpush3.bf16.msra.mxu0 %v1076_v24 }
  0x9e   : > { %967 = vmatprep.subr.bf16.mxu0 %v1268_v0 }
  0xa1   : > { %968 = vmatpush3.bf16.msra.mxu0 %v1078_v25 }
  0xa2   : > { %969 = vmatprep.subr.bf16.mxu0 %v1268_v0 }
  0xa5   : > { %970 = vmatpush3.bf16.msra.mxu0 %v1079_v26 }
 0x148   : > { %v473_v28 = vpop.f32.mrf.mxu0  ;;  %v595_v35 = vpop.f32.mrf.mxu1 }
 0x149   : > { %v474_v29 = vadd.f32 %v856_v27, %v473_v28 }
 0x14a   : > { %v933_v30 = vpop.f32.mrf.mxu0  ;;  %v953_v36 = vpop.f32.mrf.mxu1 }
 0x14b   : > { %v479_v31 = vmax.f32 %v474_v29, 0.0 }
 0x14c   : > { %v476_v32 = vpop.f32.mrf.mxu0  ;;  %v598_v37 = vpop.f32.mrf.mxu1 }
 0x14d   : > { %v480_v33 = vpack.c.bf16 %v479_v31, %v479_v31 }
 0x14e   : > { %v934_v34 = vpop.f32.mrf.mxu0  ;;  %v954_v38 = vpop.f32.mrf.mxu1 }
 0x14f   : > { %972 = vmatmul.mubr.bf16.vlgmr.msra.gmra.mxu0 %v480_v33 }
 0x20f   : > { %v683_v39 = vpop.f32.mrf.mxu0 }
 0x210   : > { %v684_v41 = vadd.f32 %v683_v39, %v595_v35 }
 0x211   : > { %v973_v42 = vpop.f32.mrf.mxu0 }
 0x212   : > { %v696_v43 = vadd.f32 %v881_v40, %v684_v41 }
 0x213   : > { %v686_v44 = vpop.f32.mrf.mxu0 }
 0x214   : > { %697 = vadd.xlane.f32.xlu0 %v696_v43 }
 0x215   : > { %v974_v45 = vpop.f32.mrf.mxu0 }
 0x29d   : > { %v698_v48 = vpop.xlane.xlu0 %697 }
 0x29e   : > { %v699_v49 = vmul.f32 0.0625, %v698_v48 }
 0x2a0   : > { %v700_v50 = vsub.f32 %v696_v43, %v699_v49 }
 0x2a2   : > { %v704_v51 = vsel %vm703_vm1, %v700_v50, 0.0 }
 0x2a3   : > { %v705_v52 = vmul.f32 %v704_v51, %v704_v51 }
 0x2a5   : > { %706 = vadd.xlane.f32.xlu0 %v705_v52 }
 0x32e   : > { %v707_v53 = vpop.xlane.xlu0 %706 }
 0x32f   : > { %v708_v54 = vmul.f32 0.0625, %v707_v53 }
 0x331   : > { %v709_v55 = vadd.f32 1e-05, %v708_v54 }
 0x333   : > { %1080 = vrsqrt.f32 %v709_v55 }
 0x340   : > { %v1081_v56 = vpop.eup %1080 }
 0x341   : > { %v711_v58 = vmul.f32 %v1081_v56, %v704_v51 }
 0x343   : > { %v719_v60 = vmul.f32 %v882_v57, %v711_v58 }
 0x345   : > { %v727_v61 = vadd.f32 %v883_v59, %v719_v60 }
 0x347   : > { %728 = vst [vmem:[%s364_s20] sm:$0xff] %v727_v61 }
 0x348   : > { %1201 = shalt.err (!%p1198_p9)
}
 0x349   : > { %s1202_s16 = scalar_lea.hbm %s741_s4, 128  ;;  %s1206_s21 = scalar_lea.hbm %s1550_s8, 256 }
 0x34a   : > { %p1203_p13 = scmp.ne.s32.totalorder %s741_s4, %s1202_s16  ;;  %p1207_p11 = scmp.lt.s32.totalorder %s741_s4, %s1550_s8 }
 0x34b   : > { %p1208_p1 = scmp.lt.s32.totalorder %s1206_s21, %s1202_s16 }
 0x34c   : > { %p1204_p8 = pnand %p1203_p13, %p1574_p6 }
 0x34d   : > { %p1209_p2 = por %p1208_p1, %p1207_p11 }
 0x34e   : > { %p1205_p10 = pneg %p1204_p8 }
 0x350   : > { %p1210_p4 = pnand %p1209_p2, %p1205_p10 }
 0x352   : > { %1213 = shalt.err (!%p1210_p4)
}
 0x353   : > { %989 = dma.vmem_to_hbm [thread:$0]  (%p1574_p6), %s744_s15, 128, %s741_s4, %s730_s11  }
 0x354 PF: > { %s755_s23 = sand.u32 1, %s1248_s27   ;;  %p1575_p12 = scmp.ne.s32.totalorder %s1559_s12, 0 }
 0x355   : > { %p1576_p0 = scmp.ge.s32.totalorder %s1260_s30, 2  ;;  %s756_s20 = scalar_lea.sflag [#allocation4], %s755_s23 }
 0x357   : > { %p1006_p5 = pnand %p1576_p0, %p1575_p12 }
 0x359   : > { %p1007_p3 = pneg %p1006_p5 }
 0x35b   : > { %1243 = dma.done.wait (%p1007_p3), %s756_s20, 128  }
 0x35c   : > { %1245 = vsyncadd (%p1007_p3), %s756_s20, 4294967168  ;;  %p23_p7 = scmp.ge.s32.totalorder %s1396_s18, 4   ;;  %s1577_s27 = smov %s1252_s28 }
 0x35d   : > { %s1578_s28 = smov %s1256_s29  ;;  %s1579_s29 = smov %s1406_s24 }
 0x35e   : > { %s1580_s30 = smov %s1396_s18  ;;  %25 = sbr.rel (!%p23_p7) target bundleno = 11 (0xb), region = 109 }
 0x363   :  { %761 = vsyncpa [#allocation3], 1 }
 0x364   :  { %763 = vsyncpa [#allocation3 + $0x1], 1 }
 0x365   :  { %764 = vsyncpa [#allocation6], 1 }
 0x366   :  { %765 = vsyncpa [#allocation9], 1 }
 0x367   :  { %766 = vsyncpa [#allocation4], 1 }
 0x368   :  { %768 = vsyncpa [#allocation4 + $0x1], 1 }

// kernel: tpu_custom_call.1
= control target key start
LH: loop header
LB: loop body
LE: loop exit
PB: predicated region body
PF: predicated region fallthrough
CT: control target
= control target key end

     0   :  { %s1542_s0 = inlined_call_operand.hbm [shape: f32[16,128], index: 0, kind: input, shape index: {}]   ;;  %s1543_s1 = inlined_call_operand.hbm [shape: bf16[128,128], index: 1, kind: input, shape index: {}]   ;;  %s1544_s2 = inlined_call_operand.vmem [shape: f32[1,128], index: 2, kind: input, shape index: {}]   ;;  %s1545_s3 = inlined_call_operand.hbm [shape: bf16[128,128], index: 3, kind: input, shape index: {}]   ;;  %s1546_s4 = inlined_call_operand.hbm [shape: bf16[128,128], index: 4, kind: input, shape index: {}]   ;;  %s1547_s5 = inlined_call_operand.vmem [shape: f32[1,128], index: 5, kind: input, shape index: {}]   ;;  %s1548_s6 = inlined_call_operand.vmem [shape: f32[1,128], index: 6, kind: input, shape index: {}]   ;;  %s1549_s7 = inlined_call_operand.vmem [shape: f32[1,128], index: 7, kind: input, shape index: {}]   ;;  %s1550_s8 = inlined_call_operand.hbm [shape: f32[16,128], index: 8, kind: output, shape index: {}]  }
   0x1   :  { %1555 = sst [smem:[#allocation15_spill]] %s1543_s1 }
   0x2   :  { %1556 = sst [smem:[#allocation16_spill]] %s1545_s3 }
   0x3   :  { %1557 = sst [smem:[#allocation17_spill]] %s1546_s4 }
   0x4   :  { %13 = vsyncpa [#allocation3], 0 }
   0x5   :  { %15 = vsyncpa [#allocation3 + $0x1], 0 }
   0x6   :  { %16 = vsyncpa [#allocation6], 0 }
   0x7   :  { %17 = vsyncpa [#allocation9], 0 }
   0x8   :  { %18 = vsyncpa [#allocation4], 0 }
   0x9   :  { %20 = vsyncpa [#allocation4 + $0x1], 0  ;;  %s1316_s27 = smov 0   ;;  %s1318_s28 = smov 0  }
   0xa   :  { %s1320_s29 = smov 0   ;;  %s1322_s30 = smov 0  }
   0xb LB: > { %s1337_s9 = sadd.s32 4294967295, %s1260_s30   ;;  %s842_s10 = sadd.s32 4294967294, %s1260_s30   ;;  %s1260_s30 = sphi %s1322_s30, %s1580_s30   ;;  %s1256_s29 = sphi %s1320_s29, %s1579_s29   ;;  %s1252_s28 = sphi %s1318_s28, %s1578_s28   ;;  %s1248_s27 = sphi %s1316_s27, %s1577_s27  }
   0xc   : > { %p46_p0 = scmp.ne.s32.totalorder %s1252_s28, %s1248_s27  ;;  %p1551_p1 = scmp.eq.s32.totalorder %s1337_s9, 0 }
   0xd   : > { %p223_p3 = scmp.eq.s32.totalorder %s842_s10, 1  ;;  %p843_p5 = scmp.ge.s32.totalorder %s1260_s30, 1 }
   0xe   : > { %p1346_p4 = por %p1551_p1, %p46_p0  ;;  %p230_p7 = scmp.lt.s32.totalorder %s1260_s30, 3 }
   0xf   : > { %p1351_p6 = por %p223_p3, %p46_p0  ;;  %s1262_s14 = smov [#allocation5]  }
  0x10   : > { %s1558_s11 = scalar_select %p1346_p4, 1, 0 }
  0x11   : > { %s1559_s12 = scalar_select %p1351_p6, 1, 0 }
  0x12   : > { %p1356_p8 = pnand %p843_p5, %p230_p7  ;;  %s242_s15 = sshll.u32 %s1262_s14, 4  ;;  %s243_s15 = int_to_ptr.vmem [resolvable:$true] %s242_s15 }
  0x13   : > { %s1263_s17 = smov [#allocation7]   ;;  %s1264_s19 = smov [#allocation8]  }
  0x14   : > { %s1560_s13 = scalar_select %p1356_p8, 1, 0 }
  0x15   : > { %p991_p9 = pneg %p1356_p8  ;;  %s258_s18 = sshll.u32 %s1263_s17, 4  ;;  %s259_s18 = int_to_ptr.vmem [resolvable:$true] %s258_s18 }
  0x16   : > { %s271_s20 = sshll.u32 %s1264_s19, 4  ;;  %s1093_s21 = scalar_lea.vmem %s243_s15, 1024  ;;  %s272_s20 = int_to_ptr.vmem [resolvable:$true] %s271_s20 }
  0x17   : > { %p1365_p11 = pnand %p991_p9, %p1551_p1  ;;  %p1094_p13 = scmp.ne.s32.totalorder %s243_s15, %s1093_s21 }
  0x18   : > { %p1101_p5 = scmp.lt.s32.totalorder %s243_s15, %s243_s15  ;;  %p1102_p7 = scmp.lt.s32.totalorder %s1093_s21, %s1093_s21 }
  0x19   : > { %p1084_p12 = pneg %p1365_p11 }
  0x1a   : > { %p1103_p9 = por %p1102_p7, %p1101_p5 }
  0x1b   : > { %p1096_p0 = pnand %p1094_p13, %p1084_p12 }
  0x1d   : > { %p1097_p3 = pneg %p1096_p0 }
  0x1f   : > { %p1104_p10 = pnand %p1103_p9, %p1097_p3 }
  0x21   : > { %1107 = shalt.err (!%p1104_p10)
}
  0x22   : > { %s1265_s22 = smov 64   ;;  %s1266_s23 = smov 4  }
  0x23   : > { %s1562_s1 = sld [smem:[#allocation15_spill]]  ;;  %s1119_s26 = scalar_lea.vmem %s259_s18, 1024 }
  0x24   : > { %p1120_p1 = scmp.ne.s32.totalorder %s259_s18, %s1119_s26  ;;  %p1127_p2 = scmp.lt.s32.totalorder %s259_s18, %s259_s18 }
  0x25   : > { %p1128_p6 = scmp.lt.s32.totalorder %s1119_s26, %s1119_s26 }
  0x26   : > { %p1122_p13 = pnand %p1120_p1, %p1084_p12 }
  0x27   : > { %p1129_p5 = por %p1128_p6, %p1127_p2 }
  0x28   : > { %p1123_p0 = pneg %p1122_p13 }
  0x29   : > { %994 = dma.hbm_to_vmem [thread:$0]  (!%p1365_p11), %s1562_s1, 1024, %s243_s15, [#allocation6], %s1265_s22, %s1265_s22, %s1266_s23  }
  0x2a   : > { %p1130_p3 = pnand %p1129_p5, %p1123_p0 }
  0x2c   : > { %1133 = shalt.err (!%p1130_p3)
}
  0x2d   : > { %s1563_s3 = sld [smem:[#allocation16_spill]]  ;;  %s1145_s15 = scalar_lea.vmem %s272_s20, 1024 }
  0x2e   : > { %p1146_p10 = scmp.ne.s32.totalorder %s272_s20, %s1145_s15  ;;  %p1153_p9 = scmp.lt.s32.totalorder %s272_s20, %s272_s20 }
  0x2f   : > { %p1154_p13 = scmp.lt.s32.totalorder %s1145_s15, %s1145_s15 }
  0x30   : > { %p1148_p7 = pnand %p1146_p10, %p1084_p12 }
  0x31   : > { %p1155_p4 = por %p1154_p13, %p1153_p9 }
  0x32   : > { %p1149_p1 = pneg %p1148_p7 }
  0x33   : > { %997 = dma.hbm_to_vmem [thread:$0]  (!%p1365_p11), %s1563_s3, 1024, %s259_s18, [#allocation6], %s1265_s22, %s1265_s22, %s1266_s23  }
  0x34   : > { %p1156_p2 = pnand %p1155_p4, %p1149_p1 }
  0x36   : > { %1159 = shalt.err (!%p1156_p2)
}
  0x37   : > { %s1564_s4 = sld [smem:[#allocation17_spill]]  ;;  %s1396_s18 = sadd.s32 1, %s1260_s30  }
  0x38   : > { %s30_s21 = ssub.s32 %s1260_s30, %s1396_s18  ;;  %s33_s16 = sadd.s32 1, %s1256_s29 }
  0x39   : > { %p31_p4 = scmp.eq.s32.totalorder %s30_s21, 0  ;;  %p40_p6 = scmp.ne.s32.totalorder %s1256_s29, %s1252_s28 }
  0x3a   : > { %p41_p12 = scmp.eq.s32.totalorder %s1260_s30, 0  ;;  %p1012_p0 = scmp.lt.s32.totalorder %s1260_s30, 2 }
  0x3b   : > { %s1406_s24 = scalar_select %p31_p4, %s1256_s29, %s33_s16  }
  0x3c   : > { %p42_p5 = por %p41_p12, %p40_p6  ;;  %p1565_p3 = scmp.eq.s32.totalorder %s1337_s9, 1 }
  0x3d   : > { %1000 = dma.hbm_to_vmem [thread:$0]  (!%p1365_p11), %s1564_s4, 1024, %s272_s20, [#allocation9], %s1265_s22, %s1265_s22, %s1266_s23  }
  0x3e   : > { %p1410_p10 = por %p1565_p3, %p40_p6  ;;  %s294_s26 = sand.u32 1, %s1256_s29  }
  0x3f   : > { %s849_s10 = sshll.u32 %s1260_s30, 7  ;;  %s848_s20 = sshll.u32 %s294_s26, 3 }
  0x40   : > { %s1566_s25 = scalar_select %p1410_p10, 1, 0 }
  0x41   : > { %s1419_s14 = scalar_lea.hbm %s1542_s0, %s849_s10  ;;  %s298_s15 = scalar_lea.vmem [#allocation2], %s848_s20 }
  0x42   : > { %s305_s17 = sshll.u32 %s298_s15, 4  ;;  %p1421_p11 = pnand %p1012_p0, %p42_p5  ;;  %s306_s17 = int_to_ptr.vmem [resolvable:$true] %s305_s17 }
  0x43   : > { %s295_s21 = scalar_lea.sflag [#allocation3], %s294_s26  ;;  %s1160_s16 = scalar_lea.hbm %s1419_s14, 128 }
  0x44   : > { %p1161_p7 = scmp.ne.s32.totalorder %s1419_s14, %s1160_s16  ;;  %p1162_p1 = pneg %p1421_p11 }
  0x45   : > { %s1165_s23 = scalar_lea.hbm %s1542_s0, 256  ;;  %p1166_p2 = scmp.lt.s32.totalorder %s1419_s14, %s1542_s0 }
  0x46   : > { %p1163_p9 = pnand %p1162_p1, %p1161_p7  ;;  %p1167_p4 = scmp.lt.s32.totalorder %s1165_s23, %s1160_s16 }
  0x48   : > { %p1164_p13 = pneg %p1163_p9  ;;  %p1168_p6 = por %p1167_p4, %p1166_p2 }
  0x4a   : > { %p1169_p12 = pnand %p1168_p6, %p1164_p13 }
  0x4c   : > { %1172 = shalt.err (!%p1169_p12)
}
  0x4d   : > { %s1173_s15 = scalar_lea.vmem %s306_s17, 128  ;;  %s1267_s26 = smov [#allocation2]  }
  0x4e   : > { %p1174_p0 = scmp.ne.s32.totalorder %s306_s17, %s1173_s15  ;;  %s1178_s3 = sshll.u32 %s1267_s26, 4  ;;  %s1179_s3 = int_to_ptr.vmem [resolvable:$false] %s1178_s3 }
  0x4f   : > { %s1180_s4 = scalar_lea.vmem %s1179_s3, 256  ;;  %p1181_p7 = scmp.lt.s32.totalorder %s306_s17, %s1179_s3 }
  0x50   : > { %p1176_p5 = pnand %p1174_p0, %p1162_p1  ;;  %p1182_p9 = scmp.lt.s32.totalorder %s1180_s4, %s1173_s15 }
  0x52   : > { %p1177_p3 = pneg %p1176_p5  ;;  %p1183_p10 = por %p1182_p9, %p1181_p7 }
  0x54   : > { %p1184_p8 = pnand %p1183_p10, %p1177_p3 }
  0x56   : > { %1187 = shalt.err (!%p1184_p8)
}
  0x57   : > { %1004 = dma.hbm_to_vmem [thread:$0]  (!%p1421_p11), %s1419_s14, 128, %s306_s17, %s295_s21  }
  0x58   : > { %p1568_p13 = scmp.ne.s32.totalorder %s1560_s13, 0 }
  0x59   : > { %s1442_s1 = sand.u32 (!%p1568_p13), 1, %s1252_s28   ;;  %p1569_p8 = scmp.ne.s32.totalorder (!%p1568_p13), %s1558_s11, 0 }
  0x5a   : > { %314 = sbr.rel (%p1568_p13) target bundleno = 852 (0x354), region = 52  ;;  %s851_s16 = sshll.u32 (!%p1568_p13), %s1442_s1, 3 }
  0x5b   : > { %s317_s3 = scalar_lea.sflag (!%p1568_p13), [#allocation3], %s1442_s1  ;;  %s1448_s4 = scalar_lea.vmem (!%p1568_p13), [#allocation2], %s851_s16 }
  0x5f   : > { %1231 = dma.done.wait (%p1569_p8), %s317_s3, 128  }
  0x60   : > { %1233 = vsyncadd (%p1569_p8), %s317_s3, 4294967168  ;;  %p1570_p10 = scmp.eq.s32.totalorder %s1337_s9, 0 }
  0x62   : > { %1235 = dma.done.wait (%p1570_p10), [#allocation6], 2048   ;;  %p1571_p11 = pmov %p1570_p10 }
  0x63   : > { %p1572_p1 = pmov %p1570_p10 }
  0x64   : > { %1237 = vsyncadd (%p1571_p11), [#allocation6], 4294965248 }
  0x65   : > { %1239 = dma.done.wait (%p1572_p1), [#allocation9], 1024   ;;  %p1573_p2 = pmov %p1572_p1 }
  0x66   : > { %v1268_v0 = vmov 0.0   ;;  %vm1269_vm0 = vmmov 0   ;;  %v1056_v1 = vld [vmem:[#allocation5 + $0x38] sm:$0xff]   ;;  %v1057_v2 = vld [vmem:[#allocation5 + $0x30] sm:$0xff]   ;;  %v1058_v3 = vld [vmem:[#allocation5 + $0x28] sm:$0xff]   ;;  %v701_v46 = vlaneseq  ;;  %s885_s23 = sshll.u32 %s1337_s9, 7 }
  0x67   : > { %1241 = vsyncadd (%p1573_p2), [#allocation9], 4294966272  ;;  %915 = vmatprep.subr.bf16.mxu0 %v1268_v0  ;;  %931 = vmatprep.mubr.msk.bf16.mxu0 %vm1269_vm0, %v1268_v0  ;;  %v1064_v4 = vld [vmem:[#allocation8 + $0x38] sm:$0xff]   ;;  %v1059_v5 = vld [vmem:[#allocation5 + $0x20] sm:$0xff]   ;;  %s364_s20 = scalar_lea.vmem [#allocation10], %s851_s16  ;;  %s730_s11 = scalar_lea.sflag [#allocation4], %s1442_s1 }
  0x68   : > { %935 = vmatprep.subr.bf16.mxu1 %v1268_v0  ;;  %951 = vmatprep.mubr.msk.bf16.mxu1 %vm1269_vm0, %v1268_v0  ;;  %v1065_v6 = vld [vmem:[#allocation8 + $0x30] sm:$0xff]   ;;  %v1060_v7 = vld [vmem:[#allocation5 + $0x18] sm:$0xff]   ;;  %v1067_v8 = vld [vmem:[#allocation8 + $0x28] sm:$0xff]   ;;  %v702_v47 = vand.u32 127, %v701_v46  ;;  %s743_s15 = sshll.u32 %s364_s20, 4  ;;  %p1574_p6 = scmp.ne.s32.totalorder %s1566_s25, 0  ;;  %s744_s15 = int_to_ptr.vmem [resolvable:$true] %s743_s15 }
  0x69   : > { %916 = vmatpush3.bf16.msra.mxu0 %v1056_v1  ;;  %936 = vmatpush3.bf16.msra.mxu1 %v1064_v4  ;;  %v1061_v9 = vld [vmem:[#allocation5 + $0x10] sm:$0xff]   ;;  %v1069_v10 = vld [vmem:[#allocation8 + $0x20] sm:$0xff]   ;;  %v1062_v11 = vld [vmem:[#allocation5 + $0x8] sm:$0xff]   ;;  %s1188_s13 = scalar_lea.vmem %s744_s15, 128  ;;  %s1270_s14 = smov [#allocation10]  }
  0x6a   : > { %917 = vmatprep.subr.bf16.mxu0 %v1268_v0  ;;  %937 = vmatprep.subr.bf16.mxu1 %v1268_v0  ;;  %v1071_v12 = vld [vmem:[#allocation8 + $0x18] sm:$0xff]   ;;  %v1063_v13 = vld [vmem:[#allocation5] sm:$0xff]   ;;  %v1073_v15 = vld [vmem:[#allocation8 + $0x10] sm:$0xff]   ;;  %vm703_vm1 = vcmp.lt.s32.totalorder %v702_v47, 16  ;;  %p1189_p4 = scmp.ne.s32.totalorder %s744_s15, %s1188_s13  ;;  %s1192_s17 = sshll.u32 %s1270_s14, 4  ;;  %s1193_s17 = int_to_ptr.vmem [resolvable:$false] %s1192_s17 }
  0x6b   : > { %v366_v14 = vld [vmem:[%s1448_s4] sm:$0xff]  ;;  %v1075_v18 = vld [vmem:[#allocation8 + $0x8] sm:$0xff]   ;;  %v1077_v20 = vld [vmem:[#allocation8] sm:$0xff]   ;;  %s741_s4 = scalar_lea.hbm %s1550_s8, %s885_s23  ;;  %s1194_s9 = scalar_lea.vmem %s1193_s17, 256 }
  0x6c   : > { %v367_v16 = vpack.c.bf16 %v366_v14, %v366_v14  ;;  %v1066_v17 = vld [vmem:[#allocation7 + $0x38] sm:$0xff]   ;;  %v1068_v19 = vld [vmem:[#allocation7 + $0x30] sm:$0xff]   ;;  %v1070_v21 = vld [vmem:[#allocation7 + $0x28] sm:$0xff]   ;;  %p1190_p12 = pnand %p1189_p4, %p1574_p6  ;;  %p1195_p5 = scmp.lt.s32.totalorder %s744_s15, %s1193_s17 }
  0x6d   : > { %918 = vmatpush3.bf16.msra.mxu0 %v1057_v2  ;;  %938 = vmatpush3.bf16.msra.mxu1 %v1065_v6  ;;  %v1072_v22 = vld [vmem:[#allocation7 + $0x20] sm:$0xff]   ;;  %v1074_v23 = vld [vmem:[#allocation7 + $0x18] sm:$0xff]   ;;  %v1076_v24 = vld [vmem:[#allocation7 + $0x10] sm:$0xff]   ;;  %p1196_p3 = scmp.lt.s32.totalorder %s1194_s9, %s1188_s13 }
  0x6e   : > { %919 = vmatprep.subr.bf16.mxu0 %v1268_v0  ;;  %939 = vmatprep.subr.bf16.mxu1 %v1268_v0  ;;  %v1078_v25 = vld [vmem:[#allocation7 + $0x8] sm:$0xff]   ;;  %v1079_v26 = vld [vmem:[#allocation7] sm:$0xff]   ;;  %v856_v27 = vld [vmem:[%s1544_s2] ss:$0 sm:$0xff]  ;;  %p1191_p0 = pneg %p1190_p12 }
  0x6f   : > { %v881_v40 = vld [vmem:[%s1547_s5] ss:$0 sm:$0xff]  ;;  %p1197_p7 = por %p1196_p3, %p1195_p5 }
  0x70   : > { %v882_v57 = vld [vmem:[%s1548_s6] ss:$0 sm:$0xff] }
  0x71   : > { %920 = vmatpush3.bf16.msra.mxu0 %v1058_v3  ;;  %940 = vmatpush3.bf16.msra.mxu1 %v1067_v8  ;;  %v883_v59 = vld [vmem:[%s1549_s7] ss:$0 sm:$0xff]  ;;  %p1198_p9 = pnand %p1197_p7, %p1191_p0 }
  0x72   : > { %921 = vmatprep.subr.bf16.mxu0 %v1268_v0  ;;  %941 = vmatprep.subr.bf16.mxu1 %v1268_v0 }
  0x75   : > { %922 = vmatpush3.bf16.msra.mxu0 %v1059_v5  ;;  %942 = vmatpush3.bf16.msra.mxu1 %v1069_v10 }
  0x76   : > { %923 = vmatprep.subr.bf16.mxu0 %v1268_v0  ;;  %943 = vmatprep.subr.bf16.mxu1 %v1268_v0 }
  0x79   : > { %924 = vmatpush3.bf16.msra.mxu0 %v1060_v7  ;;  %944 = vmatpush3.bf16.msra.mxu1 %v1071_v12 }
  0x7a   : > { %925 = vmatprep.subr.bf16.mxu0 %v1268_v0  ;;  %945 = vmatprep.subr.bf16.mxu1 %v1268_v0 }
  0x7d   : > { %926 = vmatpush3.bf16.msra.mxu0 %v1061_v9  ;;  %946 = vmatpush3.bf16.msra.mxu1 %v1073_v15 }
  0x7e   : > { %927 = vmatprep.subr.bf16.mxu0 %v1268_v0  ;;  %947 = vmatprep.subr.bf16.mxu1 %v1268_v0 }
  0x81   : > { %928 = vmatpush3.bf16.msra.mxu0 %v1062_v11  ;;  %948 = vmatpush3.bf16.msra.mxu1 %v1075_v18 }
  0x82   : > { %929 = vmatprep.subr.bf16.mxu0 %v1268_v0  ;;  %949 = vmatprep.subr.bf16.mxu1 %v1268_v0 }
  0x85   : > { %930 = vmatpush3.bf16.msra.mxu0 %v1063_v13  ;;  %950 = vmatpush3.bf16.msra.mxu1 %v1077_v20 }
  0x86   : > { %955 = vmatprep.subr.bf16.mxu0 %v1268_v0 }
  0x88   : > { %932 = vmatmul.mubr.bf16.vlgmr.msra.gmra.mxu0 %v367_v16  ;;  %952 = vmatmul.mubr.bf16.vlgmr.msra.gmra.mxu1 %v367_v16 }
  0x89   : > { %956 = vmatpush3.bf16.msra.mxu0 %v1066_v17  ;;  %971 = vmatprep.mubr.msk.bf16.mxu0 %vm1269_vm0, %v1268_v0 }
  0x8a   : > { %957 = vmatprep.subr.bf16.mxu0 %v1268_v0 }
  0x8d   : > { %958 = vmatpush3.bf16.msra.mxu0 %v1068_v19 }
  0x8e   : > { %959 = vmatprep.subr.bf16.mxu0 %v1268_v0 }
  0x91   : > { %960 = vmatpush3.bf16.msra.mxu0 %v1070_v21 }
  0x92   : > { %961 = vmatprep.subr.bf16.mxu0 %v1268_v0 }
  0x95   : > { %962 = vmatpush3.bf16.msra.mxu0 %v1072_v22 }
  0x96   : > { %963 = vmatprep.subr.bf16.mxu0 %v1268_v0 }
  0x99   : > { %964 = vmatpush3.bf16.msra.mxu0 %v1074_v23 }
  0x9a   : > { %965 = vmatprep.subr.bf16.mxu0 %v1268_v0 }
  0x9d   : > { %966 = vmatpush3.bf16.msra.mxu0 %v1076_v24 }
  0x9e   : > { %967 = vmatprep.subr.bf16.mxu0 %v1268_v0 }
  0xa1   : > { %968 = vmatpush3.bf16.msra.mxu0 %v1078_v25 }
  0xa2   : > { %969 = vmatprep.subr.bf16.mxu0 %v1268_v0 }
  0xa5   : > { %970 = vmatpush3.bf16.msra.mxu0 %v1079_v26 }
 0x148   : > { %v473_v28 = vpop.f32.mrf.mxu0  ;;  %v595_v35 = vpop.f32.mrf.mxu1 }
 0x149   : > { %v474_v29 = vadd.f32 %v856_v27, %v473_v28 }
 0x14a   : > { %v933_v30 = vpop.f32.mrf.mxu0  ;;  %v953_v36 = vpop.f32.mrf.mxu1 }
 0x14b   : > { %v479_v31 = vmax.f32 %v474_v29, 0.0 }
 0x14c   : > { %v476_v32 = vpop.f32.mrf.mxu0  ;;  %v598_v37 = vpop.f32.mrf.mxu1 }
 0x14d   : > { %v480_v33 = vpack.c.bf16 %v479_v31, %v479_v31 }
 0x14e   : > { %v934_v34 = vpop.f32.mrf.mxu0  ;;  %v954_v38 = vpop.f32.mrf.mxu1 }
 0x14f   : > { %972 = vmatmul.mubr.bf16.vlgmr.msra.gmra.mxu0 %v480_v33 }
 0x20f   : > { %v683_v39 = vpop.f32.mrf.mxu0 }
 0x210   : > { %v684_v41 = vadd.f32 %v683_v39, %v595_v35 }
 0x211   : > { %v973_v42 = vpop.f32.mrf.mxu0 }
 0x212   : > { %v696_v43 = vadd.f32 %v881_v40, %v684_v41 }
 0x213   : > { %v686_v44 = vpop.f32.mrf.mxu0 }
 0x214   : > { %697 = vadd.xlane.f32.xlu0 %v696_v43 }
 0x215   : > { %v974_v45 = vpop.f32.mrf.mxu0 }
 0x29d   : > { %v698_v48 = vpop.xlane.xlu0 %697 }
 0x29e   : > { %v699_v49 = vmul.f32 0.0625, %v698_v48 }
 0x2a0   : > { %v700_v50 = vsub.f32 %v696_v43, %v699_v49 }
 0x2a2   : > { %v704_v51 = vsel %vm703_vm1, %v700_v50, 0.0 }
 0x2a3   : > { %v705_v52 = vmul.f32 %v704_v51, %v704_v51 }
 0x2a5   : > { %706 = vadd.xlane.f32.xlu0 %v705_v52 }
 0x32e   : > { %v707_v53 = vpop.xlane.xlu0 %706 }
 0x32f   : > { %v708_v54 = vmul.f32 0.0625, %v707_v53 }
 0x331   : > { %v709_v55 = vadd.f32 1e-05, %v708_v54 }
 0x333   : > { %1080 = vrsqrt.f32 %v709_v55 }
 0x340   : > { %v1081_v56 = vpop.eup %1080 }
 0x341   : > { %v711_v58 = vmul.f32 %v1081_v56, %v704_v51 }
 0x343   : > { %v719_v60 = vmul.f32 %v882_v57, %v711_v58 }
 0x345   : > { %v727_v61 = vadd.f32 %v883_v59, %v719_v60 }
 0x347   : > { %728 = vst [vmem:[%s364_s20] sm:$0xff] %v727_v61 }
 0x348   : > { %1201 = shalt.err (!%p1198_p9)
}
 0x349   : > { %s1202_s16 = scalar_lea.hbm %s741_s4, 128  ;;  %s1206_s21 = scalar_lea.hbm %s1550_s8, 256 }
 0x34a   : > { %p1203_p13 = scmp.ne.s32.totalorder %s741_s4, %s1202_s16  ;;  %p1207_p11 = scmp.lt.s32.totalorder %s741_s4, %s1550_s8 }
 0x34b   : > { %p1208_p1 = scmp.lt.s32.totalorder %s1206_s21, %s1202_s16 }
 0x34c   : > { %p1204_p8 = pnand %p1203_p13, %p1574_p6 }
 0x34d   : > { %p1209_p2 = por %p1208_p1, %p1207_p11 }
 0x34e   : > { %p1205_p10 = pneg %p1204_p8 }
 0x350   : > { %p1210_p4 = pnand %p1209_p2, %p1205_p10 }
 0x352   : > { %1213 = shalt.err (!%p1210_p4)
}
 0x353   : > { %989 = dma.vmem_to_hbm [thread:$0]  (%p1574_p6), %s744_s15, 128, %s741_s4, %s730_s11  }
 0x354 PF: > { %s755_s23 = sand.u32 1, %s1248_s27   ;;  %p1575_p12 = scmp.ne.s32.totalorder %s1559_s12, 0 }
 0x355   : > { %p1576_p0 = scmp.ge.s32.totalorder %s1260_s30, 2  ;;  %s756_s20 = scalar_lea.sflag [#allocation4], %s755_s23 }
 0x357   : > { %p1006_p5 = pnand %p1576_p0, %p1575_p12 }
 0x359   : > { %p1007_p3 = pneg %p1006_p5 }
 0x35b   : > { %1243 = dma.done.wait (%p1007_p3), %s756_s20, 128  }
 0x35c   : > { %1245 = vsyncadd (%p1007_p3), %s756_s20, 4294967168  ;;  %p23_p7 = scmp.ge.s32.totalorder %s1396_s18, 4   ;;  %s1577_s27 = smov %s1252_s28 }
 0x35d   : > { %s1578_s28 = smov %s1256_s29  ;;  %s1579_s29 = smov %s1406_s24 }
 0x35e   : > { %s1580_s30 = smov %s1396_s18  ;;  %25 = sbr.rel (!%p23_p7) target bundleno = 11 (0xb), region = 109 }
 0x363   :  { %761 = vsyncpa [#allocation3], 1 }
 0x364   :  { %763 = vsyncpa [#allocation3 + $0x1], 1 }
 0x365   :  { %764 = vsyncpa [#allocation6], 1 }
 0x366   :  { %765 = vsyncpa [#allocation9], 1 }
 0x367   :  { %766 = vsyncpa [#allocation4], 1 }
 0x368   :  { %768 = vsyncpa [#allocation4 + $0x1], 1 }

</bundles_post_ra>
